<compile_context>
chip_gen: v7x
topology: tpu7x:2x2x1
jax: 0.10.0
libtpu: 0.0.40
codegen_flags: <defaults>
</compile_context>

<pallas_src>
import jax
import jax.numpy as jnp
from jax import lax
from jax.experimental import pallas as pl
from jax.experimental.pallas import tpu as pltpu


def _round_up(x, m):
    return ((x + m - 1) // m) * m


def _cdiv(a, b):
    return (a + b - 1) // b


def _fit_tile(dim, cap, align):
    """Smallest `align`-aligned tile that covers `dim` with the fewest blocks <= cap.

    Minimizes padding waste, e.g. dim=300, cap=512 -> 304 (not 512)."""
    dim = max(int(dim), 1)
    nblocks = _cdiv(dim, cap)
    return _round_up(_cdiv(dim, nblocks), align)


# ---------------------------- kernels ----------------------------

def _linear_kernel_acc(x_ref, w_ref, b_ref, o_ref, acc_ref):
    # x_ref: (tm, tk), w_ref: (tn, tk) native (OUT, IN) layout, b_ref: (1, tn)
    k = pl.program_id(2)

    @pl.when(k == 0)
    def _():
        acc_ref[...] = jnp.zeros_like(acc_ref)

    acc_ref[...] += lax.dot_general(
        x_ref[...], w_ref[...],
        dimension_numbers=(((1,), (1,)), ((), ())),
        preferred_element_type=jnp.float32)

    @pl.when(k == pl.num_programs(2) - 1)
    def _():
        # Bias added exactly once in f32; single downcast on store.
        o_ref[...] = (acc_ref[...] + b_ref[...].astype(jnp.float32)).astype(o_ref.dtype)


def _linear_kernel_single(x_ref, w_ref, b_ref, o_ref):
    # Whole K reduction in one step: no accumulator scratch, no init/finalize RMW pass.
    acc = lax.dot_general(
        x_ref[...], w_ref[...],
        dimension_numbers=(((1,), (1,)), ((), ())),
        preferred_element_type=jnp.float32)
    o_ref[...] = (acc + b_ref[...].astype(jnp.float32)).astype(o_ref.dtype)


# ---------------------------- wrapper ----------------------------

_TINY_FLOPS = 1 << 16  # below this, plain XLA beats pad + kernel-launch overhead


def linear(x, weight, bias, *, tm=None, tn=None, tk=None,
           compute_dtype=None, force_kernel=False):
    """y = x @ weight.T + bias (PyTorch nn.Linear). x: (B, IN), weight: (OUT, IN)."""
    B, IN = x.shape
    OUT, IN_w = weight.shape
    assert IN_w == IN, "weight in_features mismatch"
    assert bias.shape == (OUT,)

    # Tiny-shape fallback: padding to (8,128) tiles + launching a grid would dwarf the work.
    if not force_kernel and (B * IN * OUT) < _TINY_FLOPS:
        return (x @ weight.T + bias).astype(x.dtype)

    # ---- tile selection: minimize padding, feed the MXU, respect VMEM ----
    auto = (tm is None and tn is None and tk is None)
    if tm is None:
        tm = _fit_tile(B, 512, 8)
    if tn is None:
        tn = _fit_tile(OUT, 1024, 128)
    if tk is None:
        tk = _fit_tile(IN, 2048, 128)      # full K in one step whenever it fits

    # v7x megacore: give a 'parallel' axis >= 2 blocks when the problem allows,
    # so the grid can shard across both TensorCores (no effect on v5e/v6e).
    if auto and _cdiv(B, tm) == 1 and _cdiv(OUT, tn) == 1:
        if OUT >= 256:
            tn = _round_up(_cdiv(OUT, 2), 128)
        elif B >= 16:
            tm = _round_up(_cdiv(B, 2), 8)

    # Generation-aware VMEM budget (v7x: 64 MiB/TC, v5e/v6e: 128 MiB).
    info = None
    try:
        info = pltpu.get_tpu_info()
    except Exception:
        pass
    vmem_cap = getattr(info, "vmem_capacity_bytes", None) or (64 << 20)
    soft_budget = int(vmem_cap * 0.6)

    in_dt = jnp.dtype(compute_dtype) if compute_dtype is not None else jnp.dtype(x.dtype)
    out_dt = jnp.dtype(x.dtype)

    def footprint(tm_, tn_, tk_):
        # double-buffered x, W, bias tiles + double-buffered out tile + f32 acc
        return (2 * (tm_ * tk_ + tn_ * tk_ + tn_) * in_dt.itemsize
                + 2 * tm_ * tn_ * out_dt.itemsize
                + tm_ * tn_ * 4)

    if auto:
        while footprint(tm, tn, tk) > soft_budget and tk > 512:
            tk = max(512, _round_up(tk // 2, 128))
        while footprint(tm, tn, tk) > soft_budget and tn > 256:
            tn = max(256, _round_up(tn // 2, 128))
        while footprint(tm, tn, tk) > soft_budget and tm > 128:
            tm = max(128, _round_up(tm // 2, 8))

    Bp, Kp, Np = _round_up(B, tm), _round_up(IN, tk), _round_up(OUT, tn)
    nk = Kp // tk

    # Zero-pad only when the (minimally padded) tile grid does not divide exactly.
    # Padded K columns are zero so they contribute nothing to the dot; padded
    # rows/cols of the output are sliced off.
    x_p = x if (Bp == B and Kp == IN) else jnp.pad(x, ((0, Bp - B), (0, Kp - IN)))
    w_p = weight if (Np == OUT and Kp == IN) else jnp.pad(
        weight, ((0, Np - OUT), (0, Kp - IN)))
    b_p = bias.reshape(1, OUT)
    if Np != OUT:
        b_p = jnp.pad(b_p, ((0, 0), (0, Np - OUT)))

    if compute_dtype is not None:
        x_p = x_p.astype(in_dt)
        w_p = w_p.astype(in_dt)

    needed = footprint(tm, tn, tk)
    vmem_limit = int(min(max(needed + (8 << 20), 16 << 20), vmem_cap))

    if nk == 1:
        grid = (Bp // tm, Np // tn)
        out = pl.pallas_call(
            _linear_kernel_single,
            out_shape=jax.ShapeDtypeStruct((Bp, Np), out_dt),
            grid_spec=pltpu.PrefetchScalarGridSpec(
                num_scalar_prefetch=0,
                grid=grid,
                in_specs=[
                    pl.BlockSpec((tm, tk), lambda i, j: (i, 0)),   # x tile
                    pl.BlockSpec((tn, tk), lambda i, j: (j, 0)),   # W tile (native layout)
                    pl.BlockSpec((1, tn), lambda i, j: (0, j)),    # bias tile
                ],
                out_specs=pl.BlockSpec((tm, tn), lambda i, j: (i, j)),
            ),
            compiler_params=pltpu.CompilerParams(
                dimension_semantics=("parallel", "parallel"),
                vmem_limit_bytes=vmem_limit,
            ),
        )(x_p, w_p, b_p)
    else:
        grid = (Bp // tm, Np // tn, nk)
        out = pl.pallas_call(
            _linear_kernel_acc,
            out_shape=jax.ShapeDtypeStruct((Bp, Np), out_dt),
            grid_spec=pltpu.PrefetchScalarGridSpec(
                num_scalar_prefetch=0,
                grid=grid,
                in_specs=[
                    pl.BlockSpec((tm, tk), lambda i, j, k: (i, k)),   # x tile
                    pl.BlockSpec((tn, tk), lambda i, j, k: (j, k)),   # W tile (native layout)
                    pl.BlockSpec((1, tn), lambda i, j, k: (0, j)),    # bias tile
                ],
                out_specs=pl.BlockSpec((tm, tn), lambda i, j, k: (i, j)),
                scratch_shapes=[pltpu.VMEM((tm, tn), jnp.float32)],
            ),
            compiler_params=pltpu.CompilerParams(
                dimension_semantics=("parallel", "parallel", "arbitrary"),
                vmem_limit_bytes=vmem_limit,
            ),
        )(x_p, w_p, b_p)

    return out[:B, :OUT]


if __name__ == "__main__":
    key = jax.random.PRNGKey(0)

    # Shapes implied by the module: nn.Linear(1, 1) on (batch, 1),
    # weight filled with 2.0, bias with 1.0  =>  y = 2*x + 1.
    B, IN, OUT = 8, 1, 1
    x = jax.random.normal(key, (B, IN), dtype=jnp.float32)
    weight = jnp.full((OUT, IN), 2.0, dtype=jnp.float32)
    bias = jnp.full((OUT,), 1.0, dtype=jnp.float32)
    y_ref = x * 2.0 + 1.0

    # Pallas-kernel path on the module shapes (forced past the tiny-shape fallback).
    y = jax.block_until_ready(linear(x, weight, bias, force_kernel=True))
    assert jnp.allclose(y, y_ref, atol=1e-4, rtol=1e-4), "kernel mismatch (module shapes)"

    # Tiny-shape fast path (plain XLA fallback) must match too.
    y_fast = jax.block_until_ready(linear(x, weight, bias))
    assert jnp.allclose(y_fast, y_ref, atol=1e-4, rtol=1e-4), "fallback mismatch"

    # Multi-block / multi-K-step accumulator path.
    k1, k2, k3 = jax.random.split(jax.random.PRNGKey(1), 3)
    B2, IN2, OUT2 = 96, 320, 192
    x2 = jax.random.normal(k1, (B2, IN2), dtype=jnp.float32)
    w2 = jax.random.normal(k2, (OUT2, IN2), dtype=jnp.float32) * 0.05
    b2 = jax.random.normal(k3, (OUT2,), dtype=jnp.float32)
    y2 = jax.block_until_ready(linear(x2, w2, b2, tm=32, tn=128, tk=128))  # grid (3, 2, 3)
    y2_ref = x2 @ w2.T + b2
    assert jnp.allclose(y2, y2_ref, atol=2e-2, rtol=2e-2), "mismatch (multi-K tiled path)"

    # Auto-tiled single-K path with megacore N-split (grid (1, 2), no accumulator).
    k4, k5, k6 = jax.random.split(jax.random.PRNGKey(2), 3)
    B3, IN3, OUT3 = 120, 256, 384
    x3 = jax.random.normal(k4, (B3, IN3), dtype=jnp.float32)
    w3 = jax.random.normal(k5, (OUT3, IN3), dtype=jnp.float32) * 0.05
    b3 = jax.random.normal(k6, (OUT3,), dtype=jnp.float32)
    y3 = jax.block_until_ready(linear(x3, w3, b3))
    y3_ref = x3 @ w3.T + b3
    assert jnp.allclose(y3, y3_ref, atol=2e-2, rtol=2e-2), "mismatch (auto-tiled path)"

    print("KERNEL_OK")
</pallas_src>

<mosaic_0001>
module attributes {stable_mosaic.version = 11 : i64} {
  func.func @_linear_kernel_single(%arg0: i32, %arg1: i32, %arg2: memref<8x128xf32, #tpu.memory_space<vmem>>, %arg3: memref<128x128xf32, #tpu.memory_space<vmem>>, %arg4: memref<1x128xf32, #tpu.memory_space<vmem>>, %arg5: memref<8x128xf32, #tpu.memory_space<vmem>>) attributes {dimension_semantics = [#tpu.dimension_semantics<parallel>, #tpu.dimension_semantics<parallel>], iteration_bounds = array<i64: 1, 1>, scalar_prefetch = 0 : i64, scratch_operands = 0 : i64, tpu.core_type = #tpu.core_type<tc>, window_params = [{transform_indices = @transform_0, window_bounds = array<i64: 8, 128>}, {transform_indices = @transform_1, window_bounds = array<i64: 128, 128>}, {transform_indices = @transform_2, window_bounds = array<i64: 1, 128>}, {transform_indices = @transform_3, window_bounds = array<i64: 8, 128>}]} {
    %c0 = arith.constant 0 : index
    %c0_0 = arith.constant 0 : index
    %0 = vector.load %arg2[%c0, %c0_0] : memref<8x128xf32, #tpu.memory_space<vmem>>, vector<8x128xf32>
    %c0_1 = arith.constant 0 : index
    %c0_2 = arith.constant 0 : index
    %1 = vector.load %arg3[%c0_1, %c0_2] : memref<128x128xf32, #tpu.memory_space<vmem>>, vector<128x128xf32>
    %cst = arith.constant dense<0.000000e+00> : vector<8x128xf32>
    %2 = tpu.matmul %0, %1, %cst {dimension_numbers = #tpu.dot_dimension_numbers<[1], [1], [0], [0], [0, 0, 1, 0], [], []>} : vector<8x128xf32>, vector<128x128xf32>, vector<8x128xf32> -> vector<8x128xf32>
    %c0_3 = arith.constant 0 : index
    %c0_4 = arith.constant 0 : index
    %3 = vector.load %arg4[%c0_3, %c0_4] : memref<1x128xf32, #tpu.memory_space<vmem>>, vector<1x128xf32>
    %4 = vector.broadcast %3 : vector<1x128xf32> to vector<8x128xf32>
    %5 = arith.addf %2, %4 : vector<8x128xf32>
    %c0_5 = arith.constant 0 : index
    %c0_6 = arith.constant 0 : index
    %6 = vector.load %arg5[%c0_5, %c0_6] : memref<8x128xf32, #tpu.memory_space<vmem>>, vector<8x128xf32>
    tpu.vector_store %arg5[%c0_5, %c0_6], %5 {strides = array<i32>} : memref<8x128xf32, #tpu.memory_space<vmem>>, vector<8x128xf32>,
    return
  }
  func.func @transform_0(%arg0: i32, %arg1: i32) -> (i32, i32) {
    %c0_i32 = arith.constant 0 : i32
    %c0_i32_0 = arith.constant 0 : i32
    return %arg0, %c0_i32 : i32, i32
  }
  func.func @transform_1(%arg0: i32, %arg1: i32) -> (i32, i32) {
    %c0_i32 = arith.constant 0 : i32
    %c0_i32_0 = arith.constant 0 : i32
    return %arg1, %c0_i32 : i32, i32
  }
  func.func @transform_2(%arg0: i32, %arg1: i32) -> (i32, i32) {
    %c0_i32 = arith.constant 0 : i32
    %c0_i32_0 = arith.constant 0 : i32
    return %c0_i32, %arg1 : i32, i32
  }
  func.func @transform_3(%arg0: i32, %arg1: i32) -> (i32, i32) {
    %c0_i32 = arith.constant 0 : i32
    return %arg0, %arg1 : i32, i32
  }
}

</mosaic_0001>

<bundles_post_ra>
// kernel: tpu_custom_call.1
= control target key start
LH: loop header
LB: loop body
LE: loop exit
PB: predicated region body
PF: predicated region fallthrough
CT: control target
= control target key end

     0   :  { %8 = vsyncpa [#allocation3], 0  ;;  %s383_s0 = inlined_call_operand.hbm [shape: f32[8,128], index: 0, kind: input, shape index: {}]   ;;  %s384_s1 = inlined_call_operand.hbm [shape: f32[128,128], index: 1, kind: input, shape index: {}]   ;;  %s385_s2 = inlined_call_operand.vmem [shape: f32[1,128], index: 2, kind: input, shape index: {}]   ;;  %s386_s3 = inlined_call_operand.hbm [shape: f32[8,128], index: 3, kind: output, shape index: {}]  }
   0x1   :  { %9 = vsyncpa [#allocation6], 0 }
   0x2   :  { %10 = vsyncpa [#allocation4], 0  ;;  %s309_s12 = smov [#allocation2]   ;;  %s310_s14 = smov [#allocation5]  }
   0x3   :  { %s17_s13 = sshll.u32 %s309_s12, 4  ;;  %s26_s15 = sshll.u32 %s310_s14, 4  ;;  %s18_s13 = int_to_ptr.vmem [resolvable:$true] %s17_s13  ;;  %s337_s15 = int_to_ptr.vmem [resolvable:$true] %s26_s15 }
   0x4   :  { %s237_s18 = scalar_lea.hbm %s383_s0, 128 }
   0x5   :  { %p238_p0 = scmp.ne.s32.totalorder %s383_s0, %s237_s18  ;;  %p241_p1 = scmp.lt.u32.totalorder %s237_s18, %s383_s0 }
   0x7   :  { %p243_p2 = pnand %p241_p1, %p238_p0 }
   0x9   :  { %246 = shalt.err (!%p243_p2)
}
   0xa   :  { %s247_s23 = scalar_lea.vmem %s18_s13, 128  ;;  %p252_p4 = scmp.lt.s32.totalorder %s18_s13, %s18_s13 }
   0xb   :  { %p248_p3 = scmp.ne.s32.totalorder %s18_s13, %s247_s23  ;;  %p253_p5 = scmp.lt.s32.totalorder %s247_s23, %s247_s23 }
   0xd   :  { %p254_p6 = por %p253_p5, %p252_p4 }
   0xf   :  { %p255_p7 = pnand %p254_p6, %p248_p3 }
  0x11   :  { %258 = shalt.err (!%p255_p7)
}
  0x12   :  { %20 = dma.hbm_to_vmem [thread:$0]  %s383_s0, 128, %s18_s13, [#allocation3]  }
  0x13   :  { %s259_s28 = scalar_lea.hbm %s384_s1, 2048 }
  0x14   :  { %p260_p8 = scmp.ne.s32.totalorder %s384_s1, %s259_s28  ;;  %p263_p9 = scmp.lt.u32.totalorder %s259_s28, %s384_s1 }
  0x16   :  { %p265_p10 = pnand %p263_p9, %p260_p8 }
  0x18   :  { %268 = shalt.err (!%p265_p10)
}
  0x19   :  { %s269_s6 = scalar_lea.vmem %s337_s15, 2048  ;;  %p274_p12 = scmp.lt.s32.totalorder %s337_s15, %s337_s15 }
  0x1a   :  { %p270_p11 = scmp.ne.s32.totalorder %s337_s15, %s269_s6  ;;  %p275_p13 = scmp.lt.s32.totalorder %s269_s6, %s269_s6 }
  0x1c   :  { %p276_p0 = por %p275_p13, %p274_p12 }
  0x1e   :  { %p277_p1 = pnand %p276_p0, %p270_p11 }
  0x20   :  { %280 = shalt.err (!%p277_p1)
}
  0x21   :  { %s311_s0 = smov 128   ;;  %s312_s7 = smov 8  }
  0x22   :  { %32 = dma.hbm_to_vmem [thread:$0]  %s384_s1, 2048, %s337_s15, [#allocation6], %s311_s0, %s311_s0, %s312_s7  }
  0x23   :  { %303 = dma.done.wait [#allocation3], 128  }
  0x24   :  { %304 = vsyncadd [#allocation3], 4294967168 }
  0x25   :  { %305 = dma.done.wait [#allocation6], 2048  }
  0x26   :  { %306 = vsyncadd [#allocation6], 4294965248  ;;  %v313_v0 = vmov 0.0|0.0   ;;  %vm314_vm0 = vmmov 0   ;;  %v315_v1 = vmov 0.0   ;;  %v42_v2 = vld [vmem:[#allocation5] sm:$0xff] }
  0x27   :  { %205 = vmatprep.subr.bf16.mxu0 %v313_v0  ;;  %202 = vmatprep.mubr.msk.f32.mxu0 %vm314_vm0, %v315_v1  ;;  %v43_v3 = vld [vmem:[#allocation5 + $0x8] sm:$0xff]  ;;  %v44_v5 = vld [vmem:[#allocation5 + $0x10] sm:$0xff]  ;;  %v45_v6 = vld [vmem:[#allocation5 + $0x18] sm:$0xff]  ;;  %s316_s11 = smov [#allocation7]  }
  0x28   :  { %v206_v4 = vpack.c.bf16 %v43_v3, %v42_v2  ;;  %v209_v7 = vpack.c.bf16 %v45_v6, %v44_v5  ;;  %v46_v8 = vld [vmem:[#allocation5 + $0x20] sm:$0xff]  ;;  %v47_v9 = vld [vmem:[#allocation5 + $0x28] sm:$0xff]  ;;  %v48_v11 = vld [vmem:[#allocation5 + $0x30] sm:$0xff]  ;;  %s142_s12 = sshll.u32 %s316_s11, 4  ;;  %s143_s12 = int_to_ptr.vmem [resolvable:$true] %s142_s12 }
  0x29   :  { %v212_v10 = vpack.c.bf16 %v47_v9, %v46_v8  ;;  %v49_v12 = vld [vmem:[#allocation5 + $0x38] sm:$0xff]  ;;  %v50_v14 = vld [vmem:[#allocation5 + $0x40] sm:$0xff]  ;;  %v51_v15 = vld [vmem:[#allocation5 + $0x48] sm:$0xff]  ;;  %s281_s13 = scalar_lea.vmem %s143_s12, 128  ;;  %p286_p3 = scmp.lt.s32.totalorder %s143_s12, %s143_s12 }
  0x2a   :  { %207 = vmatpush3.bf16.xpose.msra.mxu0 %v206_v4  ;;  %v215_v13 = vpack.c.bf16 %v49_v12, %v48_v11  ;;  %v218_v16 = vpack.c.bf16 %v51_v15, %v50_v14  ;;  %v52_v17 = vld [vmem:[#allocation5 + $0x50] sm:$0xff]  ;;  %v53_v18 = vld [vmem:[#allocation5 + $0x58] sm:$0xff]  ;;  %v54_v20 = vld [vmem:[#allocation5 + $0x60] sm:$0xff]  ;;  %p282_p2 = scmp.ne.s32.totalorder %s143_s12, %s281_s13  ;;  %p287_p4 = scmp.lt.s32.totalorder %s281_s13, %s281_s13 }
  0x2b   :  { %208 = vmatprep.subr.bf16.mxu0 %v313_v0  ;;  %v221_v19 = vpack.c.bf16 %v53_v18, %v52_v17  ;;  %v55_v21 = vld [vmem:[#allocation5 + $0x68] sm:$0xff]  ;;  %v56_v23 = vld [vmem:[#allocation5 + $0x70] sm:$0xff]  ;;  %v57_v24 = vld [vmem:[#allocation5 + $0x78] sm:$0xff] }
  0x2c   :  { %v224_v22 = vpack.c.bf16 %v55_v21, %v54_v20  ;;  %v227_v25 = vpack.c.bf16 %v57_v24, %v56_v23  ;;  %v41_v26 = vld [vmem:[#allocation2] sm:$0xff]  ;;  %p288_p5 = por %p287_p4, %p286_p3 }
  0x2d   :  { %v152_v27 = vld [vmem:[%s385_s2] ss:$0 sm:$0xff] }
  0x2e   :  { %p289_p6 = pnand %p288_p5, %p282_p2 }
  0x32   :  { %210 = vmatpush3.bf16.xpose.msra.mxu0 %v209_v7 }
  0x33   :  { %211 = vmatprep.subr.bf16.mxu0 %v313_v0 }
  0x3a   :  { %213 = vmatpush3.bf16.xpose.msra.mxu0 %v212_v10 }
  0x3b   :  { %214 = vmatprep.subr.bf16.mxu0 %v313_v0 }
  0x42   :  { %216 = vmatpush3.bf16.xpose.msra.mxu0 %v215_v13 }
  0x43   :  { %217 = vmatprep.subr.bf16.mxu0 %v313_v0 }
  0x4a   :  { %219 = vmatpush3.bf16.xpose.msra.mxu0 %v218_v16 }
  0x4b   :  { %220 = vmatprep.subr.bf16.mxu0 %v313_v0 }
  0x52   :  { %222 = vmatpush3.bf16.xpose.msra.mxu0 %v221_v19 }
  0x53   :  { %223 = vmatprep.subr.bf16.mxu0 %v313_v0 }
  0x5a   :  { %225 = vmatpush3.bf16.xpose.msra.mxu0 %v224_v22 }
  0x5b   :  { %226 = vmatprep.subr.bf16.mxu0 %v313_v0 }
  0x62   :  { %228 = vmatpush3.bf16.xpose.msra.mxu0 %v227_v25 }
  0x69   :  { %203 = vmatmul.mubr.f32.vlgmr.msra.gmra.mrb[0].mxu0 %v41_v26 }
 0x13c   :  { %v131_v28 = vpop.f32.mrb[0].mxu0 }
 0x13d   :  { %v132_v29 = vadd.f32 %v152_v27, %v131_v28  ;;  %v204_v30 = vpop.f32.mrb[1].mxu0 }
 0x13f   :  { %135 = vst [vmem:[#allocation7] sm:$0xff] %v132_v29 }
 0x140   :  { %292 = shalt.err (!%p289_p6)
}
 0x141   :  { %s293_s16 = scalar_lea.hbm %s386_s3, 128 }
 0x142   :  { %p294_p7 = scmp.ne.s32.totalorder %s386_s3, %s293_s16  ;;  %p297_p8 = scmp.lt.u32.totalorder %s293_s16, %s386_s3 }
 0x144   :  { %p299_p9 = pnand %p297_p8, %p294_p7 }
 0x146   :  { %302 = shalt.err (!%p299_p9)
}
 0x147   :  { %145 = dma.vmem_to_hbm [thread:$0]  %s143_s12, 128, %s386_s3, [#allocation4]  }
 0x148   :  { %307 = dma.done.wait [#allocation4], 128  }
 0x149   :  { %308 = vsyncadd [#allocation4], 4294967168 }
 0x14a   :  { %149 = vsyncpa [#allocation3], 1 }
 0x14b   :  { %150 = vsyncpa [#allocation6], 1 }
 0x14c   :  { %151 = vsyncpa [#allocation4], 1 }

</bundles_post_ra>
